<compile_context>
chip_gen: v7x
topology: tpu7x:2x2x1
jax: 0.10.0
libtpu: 0.0.40
codegen_flags: <defaults>
</compile_context>

<pallas_src>
import jax
import jax.numpy as jnp
from jax import lax
from jax.experimental import pallas as pl
from jax.experimental.pallas import tpu as pltpu

LANES = 128
SUBLANES = 8
CHUNK = SUBLANES * LANES  # 1024 elements == one f32 vreg


def _make_kernel(block_rows: int, steps_per_core: int, valid_rows: int):
    def wl1_kernel(p_ref, t_ref, w_ref, o_ref, acc_ref):
        c = pl.program_id(0)  # core-split axis ("parallel"; size 1 on 1-TC chips)
        j = pl.program_id(1)  # sequential reduction steps within a core

        @pl.when(j == 0)
        def _():
            acc_ref[...] = jnp.zeros_like(acc_ref)

        p = p_ref[...].astype(jnp.float32)
        t = t_ref[...].astype(jnp.float32)
        w = w_ref[...].astype(jnp.float32)
        x = jnp.abs(p - t) * w  # (block_rows, 128)

        row0 = (c * steps_per_core + j) * block_rows
        is_interior = row0 + block_rows <= valid_rows

        @pl.when(is_interior)
        def _():
            # Interior block: pure VPU adds, no mask. Lane/sublane-wise
            # accumulation into the (8,128) vreg accumulator; no cross-lane
            # reduce and no scalar RMW chain in the hot loop.
            acc_ref[...] += jnp.sum(x.reshape(-1, SUBLANES, LANES), axis=0)

        @pl.when(jnp.logical_not(is_interior))
        def _():
            # Boundary (partial) block, or a clamped duplicate block on the
            # multi-core split: rows at/after `valid_rows` hold unspecified
            # data, so select with jnp.where (never multiply-by-mask:
            # 0 * NaN from uninitialized boundary data would poison the sum).
            local = lax.broadcasted_iota(jnp.int32, (block_rows, 1), 0)
            xm = jnp.where(row0 + local < valid_rows, x, jnp.float32(0.0))
            acc_ref[...] += jnp.sum(xm.reshape(-1, SUBLANES, LANES), axis=0)

        @pl.when(j == pl.num_programs(1) - 1)
        def _():
            # Single cross-lane/sublane reduce per core -> unnormalized
            # partial sum (the mean's divide happens in the wrapper).
            o_ref[0, 0] = jnp.sum(acc_ref[...])

    return wl1_kernel


def _chip_config():
    """Heuristic per-chip defaults: (core_splits, block_rows, vmem_limit_bytes)."""
    kind = ""
    try:
        kind = jax.devices()[0].device_kind.lower()
    except Exception:
        pass
    if "v7" in kind or "7x" in kind:
        # 2 TCs, 64 MiB VMEM, 3.2 TB/s: big tiles + explicit VMEM budget.
        # TODO(synk): swap "parallel" for pltpu.CORE_PARALLEL after trace-verifying both TCs engage.
        return 2, 8192, 40 << 20
    if "v6" in kind:
        # Single TC, 128 MiB physical VMEM: 8192-row tiles (24 MiB dbl-buffered).
        return 1, 8192, 40 << 20
    if "v5e" in kind or "v5 lite" in kind:
        # Single TC, 16 MiB default scoped VMEM: 4096 rows fits without flags.
        return 1, 4096, None
    if "v4" in kind or "v5p" in kind or "v5" in kind:
        # Megacore chips: 2 TCs, generous VMEM.
        return 2, 4096, 32 << 20
    return 1, 2048, None  # unknown: conservative, known-good config


def weighted_l1_loss(pred, target, weights, block_rows=None):
    """torch.mean(nn.L1Loss(reduction='none')(pred, target) * weights)."""
    assert pred.shape == target.shape == weights.shape
    n = pred.size  # denominator of the mean (true element count)

    num_cores, default_rows, vmem_limit = _chip_config()
    if block_rows is None:
        block_rows = default_rows

    flat_p = pred.reshape(-1)
    flat_t = target.reshape(-1)
    flat_w = weights.reshape(-1)

    # Aligned prefix goes through the kernel; the ragged (<1024-element) tail
    # is reduced with a tiny plain-JAX sum.  No jnp.pad copies of the inputs.
    aligned = (n // CHUNK) * CHUNK
    tail_sum = jnp.float32(0.0)
    if aligned < n:
        pt = flat_p[aligned:].astype(jnp.float32)
        tt = flat_t[aligned:].astype(jnp.float32)
        wt = flat_w[aligned:].astype(jnp.float32)
        tail_sum = jnp.sum(jnp.abs(pt - tt) * wt)

    if aligned == 0:
        # Fewer than 1024 elements: the plain-JAX tail already covers it all.
        return tail_sum / jnp.float32(n)

    rows = aligned // LANES  # multiple of 8 by construction

    # Tile size: multiple of 8 sublanes, capped at the actual row count.
    block_rows = max(SUBLANES, (block_rows // SUBLANES) * SUBLANES)
    block_rows = min(block_rows, rows)

    total_blocks = pl.cdiv(rows, block_rows)
    steps_per_core = pl.cdiv(total_blocks, num_cores)

    p2 = flat_p[:aligned].reshape(rows, LANES)
    t2 = flat_t[:aligned].reshape(rows, LANES)
    w2 = flat_w[:aligned].reshape(rows, LANES)

    def in_map(c, j):
        # Clamp so every DMA stays within the array; partial / duplicated
        # logical blocks are zeroed by the in-kernel boundary mask.
        return (jnp.minimum(c * steps_per_core + j, total_blocks - 1), 0)

    block = pl.BlockSpec((block_rows, LANES), in_map)

    compiler_kwargs = dict(dimension_semantics=("parallel", "arbitrary"))
    if vmem_limit is not None:
        compiler_kwargs["vmem_limit_bytes"] = vmem_limit

    partials = pl.pallas_call(
        _make_kernel(block_rows, steps_per_core, rows),
        out_shape=jax.ShapeDtypeStruct((num_cores, 1), jnp.float32),
        grid_spec=pltpu.PrefetchScalarGridSpec(
            num_scalar_prefetch=0,
            grid=(num_cores, steps_per_core),
            in_specs=[block, block, block],
            out_specs=pl.BlockSpec(
                (1, 1), lambda c, j: (c, 0), memory_space=pltpu.SMEM
            ),
            scratch_shapes=[pltpu.VMEM((SUBLANES, LANES), jnp.float32)],
        ),
        compiler_params=pltpu.CompilerParams(**compiler_kwargs),
    )(p2, t2, w2)

    # torch.mean divides by the total element count.
    return (jnp.sum(partials) + tail_sum) / jnp.float32(n)


if __name__ == "__main__":
    key = jax.random.PRNGKey(0)
    k1, k2, k3 = jax.random.split(key, 3)

    # Small NCHW shapes consistent with the module's usage (ZSSR image batches).
    shape = (2, 4, 16, 16)
    pred = jax.random.normal(k1, shape, dtype=jnp.float32)
    target = jax.random.normal(k2, shape, dtype=jnp.float32)
    weights = jax.random.uniform(k3, shape, dtype=jnp.float32)

    loss = jax.block_until_ready(weighted_l1_loss(pred, target, weights))
    ref = jnp.mean(jnp.abs(pred - target) * weights)
    assert jnp.allclose(loss, ref, rtol=1e-5, atol=1e-6), (loss, ref)

    # Unaligned element count (3*5*13*11 = 2145) exercises the no-pad
    # aligned-prefix + ragged-tail path.
    shape2 = (3, 5, 13, 11)
    p2 = jax.random.normal(k1, shape2, dtype=jnp.float32)
    t2 = jax.random.normal(k2, shape2, dtype=jnp.float32)
    w2 = jax.random.uniform(k3, shape2, dtype=jnp.float32)
    loss2 = jax.block_until_ready(weighted_l1_loss(p2, t2, w2))
    ref2 = jnp.mean(jnp.abs(p2 - t2) * w2)
    assert jnp.allclose(loss2, ref2, rtol=1e-5, atol=1e-6), (loss2, ref2)

    print("KERNEL_OK")
</pallas_src>

<mosaic_0001>
module attributes {stable_mosaic.version = 11 : i64} {
  func.func @wl1_kernel(%arg0: i32, %arg1: i32, %arg2: memref<16x128xf32, #tpu.memory_space<vmem>>, %arg3: memref<16x128xf32, #tpu.memory_space<vmem>>, %arg4: memref<16x128xf32, #tpu.memory_space<vmem>>, %arg5: memref<1x1xf32, #tpu.memory_space<smem>>, %arg6: memref<8x128xf32, #tpu.memory_space<vmem>>) attributes {dimension_semantics = [#tpu.dimension_semantics<parallel>, #tpu.dimension_semantics<arbitrary>], iteration_bounds = array<i64: 1, 1>, scalar_prefetch = 0 : i64, scratch_operands = 1 : i64, tpu.core_type = #tpu.core_type<tc>, window_params = [{transform_indices = @transform_0, window_bounds = array<i64: 16, 128>}, {transform_indices = @transform_1, window_bounds = array<i64: 16, 128>}, {transform_indices = @transform_2, window_bounds = array<i64: 16, 128>}, {transform_indices = @transform_3, window_bounds = array<i64: 1, 1>}]} {
    %c0_i32 = arith.constant 0 : i32
    %0 = arith.cmpi eq, %arg1, %c0_i32 : i32
    %1 = arith.extui %0 : i1 to i32
    %c0_i32_0 = arith.constant 0 : i32
    %2 = arith.cmpi ne, %1, %c0_i32_0 : i32
    scf.if %2 {
      %cst = arith.constant 0.000000e+00 : f32
      %22 = vector.broadcast %cst : f32 to vector<8x128xf32>
      %c0_12 = arith.constant 0 : index
      %c0_13 = arith.constant 0 : index
      %23 = vector.load %arg6[%c0_12, %c0_13] : memref<8x128xf32, #tpu.memory_space<vmem>>, vector<8x128xf32>
      tpu.vector_store %arg6[%c0_12, %c0_13], %22 {strides = array<i32>} : memref<8x128xf32, #tpu.memory_space<vmem>>, vector<8x128xf32>,
    } else {
    }
    %c0 = arith.constant 0 : index
    %c0_1 = arith.constant 0 : index
    %3 = vector.load %arg2[%c0, %c0_1] : memref<16x128xf32, #tpu.memory_space<vmem>>, vector<16x128xf32>
    %c0_2 = arith.constant 0 : index
    %c0_3 = arith.constant 0 : index
    %4 = vector.load %arg3[%c0_2, %c0_3] : memref<16x128xf32, #tpu.memory_space<vmem>>, vector<16x128xf32>
    %c0_4 = arith.constant 0 : index
    %c0_5 = arith.constant 0 : index
    %5 = vector.load %arg4[%c0_4, %c0_5] : memref<16x128xf32, #tpu.memory_space<vmem>>, vector<16x128xf32>
    %6 = arith.subf %3, %4 : vector<16x128xf32>
    %7 = math.absf %6 : vector<16x128xf32>
    %8 = arith.mulf %7, %5 : vector<16x128xf32>
    %c1_i32 = arith.constant 1 : i32
    %9 = arith.muli %arg0, %c1_i32 : i32
    %10 = arith.addi %9, %arg1 : i32
    %c16_i32 = arith.constant 16 : i32
    %11 = arith.muli %10, %c16_i32 : i32
    %c16_i32_6 = arith.constant 16 : i32
    %12 = arith.addi %11, %c16_i32_6 : i32
    %c16_i32_7 = arith.constant 16 : i32
    %13 = arith.cmpi sle, %12, %c16_i32_7 : i32
    %14 = arith.extui %13 : i1 to i32
    %c0_i32_8 = arith.constant 0 : i32
    %15 = arith.cmpi ne, %14, %c0_i32_8 : i32
    scf.if %15 {
      %c0_12 = arith.constant 0 : index
      %c0_13 = arith.constant 0 : index
      %22 = vector.load %arg6[%c0_12, %c0_13] : memref<8x128xf32, #tpu.memory_space<vmem>>, vector<8x128xf32>
      %23 = vector.shape_cast %8 : vector<16x128xf32> to vector<2x8x128xf32>
      %cst = arith.constant dense<0.000000e+00> : vector<8x128xf32>
      %24 = vector.multi_reduction <add>, %23, %cst [0] : vector<2x8x128xf32> to vector<8x128xf32>
      %25 = arith.addf %22, %24 : vector<8x128xf32>
      %c0_14 = arith.constant 0 : index
      %c0_15 = arith.constant 0 : index
      %26 = vector.load %arg6[%c0_14, %c0_15] : memref<8x128xf32, #tpu.memory_space<vmem>>, vector<8x128xf32>
      tpu.vector_store %arg6[%c0_14, %c0_15], %25 {strides = array<i32>} : memref<8x128xf32, #tpu.memory_space<vmem>>, vector<8x128xf32>,
    } else {
    }
    %true = arith.constant true
    %16 = arith.xori %13, %true : i1
    %17 = arith.extui %16 : i1 to i32
    %c0_i32_9 = arith.constant 0 : i32
    %18 = arith.cmpi ne, %17, %c0_i32_9 : i32
    scf.if %18 {
      %22 = tpu.iota {dimensions = array<i32: 0>} : vector<16x1xi32>
      %23 = vector.broadcast %11 : i32 to vector<16x1xi32>
      %24 = arith.addi %23, %22 : vector<16x1xi32>
      %c16_i32_12 = arith.constant 16 : i32
      %25 = vector.broadcast %c16_i32_12 : i32 to vector<16x1xi32>
      %26 = arith.cmpi slt, %24, %25 : vector<16x1xi32>
      %cst = arith.constant 0.000000e+00 : f32
      %27 = vector.shape_cast %26 : vector<16x1xi1> to vector<16x1xi1>
      %28 = vector.broadcast %27 : vector<16x1xi1> to vector<16x128xi1>
      %29 = vector.broadcast %cst : f32 to vector<16x128xf32>
      %30 = arith.select %28, %8, %29 : vector<16x128xi1>, vector<16x128xf32>
      %c0_13 = arith.constant 0 : index
      %c0_14 = arith.constant 0 : index
      %31 = vector.load %arg6[%c0_13, %c0_14] : memref<8x128xf32, #tpu.memory_space<vmem>>, vector<8x128xf32>
      %32 = vector.shape_cast %30 : vector<16x128xf32> to vector<2x8x128xf32>
      %cst_15 = arith.constant dense<0.000000e+00> : vector<8x128xf32>
      %33 = vector.multi_reduction <add>, %32, %cst_15 [0] : vector<2x8x128xf32> to vector<8x128xf32>
      %34 = arith.addf %31, %33 : vector<8x128xf32>
      %c0_16 = arith.constant 0 : index
      %c0_17 = arith.constant 0 : index
      %35 = vector.load %arg6[%c0_16, %c0_17] : memref<8x128xf32, #tpu.memory_space<vmem>>, vector<8x128xf32>
      tpu.vector_store %arg6[%c0_16, %c0_17], %34 {strides = array<i32>} : memref<8x128xf32, #tpu.memory_space<vmem>>, vector<8x128xf32>,
    } else {
    }
    %c0_i32_10 = arith.constant 0 : i32
    %19 = arith.cmpi eq, %arg1, %c0_i32_10 : i32
    %20 = arith.extui %19 : i1 to i32
    %c0_i32_11 = arith.constant 0 : i32
    %21 = arith.cmpi ne, %20, %c0_i32_11 : i32
    scf.if %21 {
      %c0_12 = arith.constant 0 : index
      %c0_13 = arith.constant 0 : index
      %22 = vector.load %arg6[%c0_12, %c0_13] : memref<8x128xf32, #tpu.memory_space<vmem>>, vector<8x128xf32>
      %23 = vector.shape_cast %22 : vector<8x128xf32> to vector<1x8x128xf32>
      %cst = arith.constant dense<0.000000e+00> : vector<1xf32>
      %24 = vector.multi_reduction <add>, %23, %cst [1, 2] : vector<1x8x128xf32> to vector<1xf32>
      %25 = vector.shape_cast %24 : vector<1xf32> to vector<1x1x1xf32>
      %26 = vector.extract %25[0, 0, 0] : f32 from vector<1x1x1xf32>
      %c0_14 = arith.constant 0 : index
      %c0_15 = arith.constant 0 : index
      %27 = memref.load %arg5[%c0_14, %c0_15] : memref<1x1xf32, #tpu.memory_space<smem>>
      memref.store %26, %arg5[%c0_14, %c0_15] : memref<1x1xf32, #tpu.memory_space<smem>>
    } else {
    }
    return
  }
  func.func @transform_0(%arg0: i32, %arg1: i32) -> (i32, i32) {
    %c1_i32 = arith.constant 1 : i32
    %0 = arith.muli %arg0, %c1_i32 : i32
    %1 = arith.addi %0, %arg1 : i32
    %c0_i32 = arith.constant 0 : i32
    %2 = arith.minsi %1, %c0_i32 : i32
    %c0_i32_0 = arith.constant 0 : i32
    %c0_i32_1 = arith.constant 0 : i32
    return %2, %c0_i32_0 : i32, i32
  }
  func.func @transform_1(%arg0: i32, %arg1: i32) -> (i32, i32) {
    %c1_i32 = arith.constant 1 : i32
    %0 = arith.muli %arg0, %c1_i32 : i32
    %1 = arith.addi %0, %arg1 : i32
    %c0_i32 = arith.constant 0 : i32
    %2 = arith.minsi %1, %c0_i32 : i32
    %c0_i32_0 = arith.constant 0 : i32
    %c0_i32_1 = arith.constant 0 : i32
    return %2, %c0_i32_0 : i32, i32
  }
  func.func @transform_2(%arg0: i32, %arg1: i32) -> (i32, i32) {
    %c1_i32 = arith.constant 1 : i32
    %0 = arith.muli %arg0, %c1_i32 : i32
    %1 = arith.addi %0, %arg1 : i32
    %c0_i32 = arith.constant 0 : i32
    %2 = arith.minsi %1, %c0_i32 : i32
    %c0_i32_0 = arith.constant 0 : i32
    %c0_i32_1 = arith.constant 0 : i32
    return %2, %c0_i32_0 : i32, i32
  }
  func.func @transform_3(%arg0: i32, %arg1: i32) -> (i32, i32) {
    %c0_i32 = arith.constant 0 : i32
    %c0_i32_0 = arith.constant 0 : i32
    return %arg0, %c0_i32 : i32, i32
  }
}

</mosaic_0001>

<bundles_post_ra>
// kernel: tpu_custom_call.1
= control target key start
LH: loop header
LB: loop body
LE: loop exit
PB: predicated region body
PF: predicated region fallthrough
CT: control target
= control target key end

     0   :  { %8 = vsyncpa [#allocation4], 0  ;;  %s352_s0 = inlined_call_operand.hbm [shape: f32[16,128], index: 0, kind: input, shape index: {}]   ;;  %s353_s1 = inlined_call_operand.hbm [shape: f32[16,128], index: 1, kind: input, shape index: {}]   ;;  %s354_s2 = inlined_call_operand.hbm [shape: f32[16,128], index: 2, kind: input, shape index: {}]   ;;  %s355_s3 = inlined_call_operand.hbm [shape: f32[1,1], index: 3, kind: output, shape index: {}]  }
   0x1   :  { %9 = vsyncpa [#allocation7], 0 }
   0x2   :  { %10 = vsyncpa [#allocation5], 0  ;;  %s262_s12 = smov [#allocation6]   ;;  %s263_s14 = smov [#allocation3]  }
   0x3   :  { %s40_s13 = sshll.u32 %s262_s12, 4  ;;  %s22_s15 = sshll.u32 %s263_s14, 4  ;;  %s41_s13 = int_to_ptr.vmem [resolvable:$true] %s40_s13  ;;  %s288_s15 = int_to_ptr.vmem [resolvable:$true] %s22_s15 }
   0x4   :  { %s180_s18 = scalar_lea.hbm %s353_s1, 256 }
   0x5   :  { %p181_p0 = scmp.ne.s32.totalorder %s353_s1, %s180_s18  ;;  %p184_p1 = scmp.lt.u32.totalorder %s180_s18, %s353_s1 }
   0x7   :  { %p186_p2 = pnand %p184_p1, %p181_p0 }
   0x9   :  { %189 = shalt.err (!%p186_p2)
}
   0xa   :  { %s190_s23 = scalar_lea.vmem %s41_s13, 256  ;;  %p195_p4 = scmp.lt.s32.totalorder %s41_s13, %s41_s13 }
   0xb   :  { %p191_p3 = scmp.ne.s32.totalorder %s41_s13, %s190_s23  ;;  %p196_p5 = scmp.lt.s32.totalorder %s190_s23, %s190_s23 }
   0xd   :  { %p197_p6 = por %p196_p5, %p195_p4 }
   0xf   :  { %p198_p7 = pnand %p197_p6, %p191_p3 }
  0x11   :  { %201 = shalt.err (!%p198_p7)
}
  0x12   :  { %s264_s24 = smov 128   ;;  %s265_s25 = smov 8  }
  0x13   :  { %46 = dma.hbm_to_vmem [thread:$0]  %s353_s1, 256, %s41_s13, [#allocation7], %s264_s24, %s264_s24, %s265_s25  }
  0x14   :  { %s202_s30 = scalar_lea.hbm %s352_s0, 256 }
  0x15   :  { %p203_p8 = scmp.ne.s32.totalorder %s352_s0, %s202_s30  ;;  %p206_p9 = scmp.lt.u32.totalorder %s202_s30, %s352_s0 }
  0x17   :  { %p208_p10 = pnand %p206_p9, %p203_p8 }
  0x19   :  { %211 = shalt.err (!%p208_p10)
}
  0x1a   :  { %s212_s8 = scalar_lea.vmem %s288_s15, 256  ;;  %p217_p12 = scmp.lt.s32.totalorder %s288_s15, %s288_s15 }
  0x1b   :  { %p213_p11 = scmp.ne.s32.totalorder %s288_s15, %s212_s8  ;;  %p218_p13 = scmp.lt.s32.totalorder %s212_s8, %s212_s8 }
  0x1d   :  { %p219_p0 = por %p218_p13, %p217_p12 }
  0x1f   :  { %p220_p1 = pnand %p219_p0, %p213_p11 }
  0x21   :  { %223 = shalt.err (!%p220_p1)
}
  0x22   :  { %28 = dma.hbm_to_vmem [thread:$0]  %s352_s0, 256, %s288_s15, [#allocation4], %s264_s24, %s264_s24, %s265_s25  }
  0x23   :  { %s266_s10 = smov [#allocation8]   ;;  %s224_s14 = scalar_lea.hbm %s354_s2, 256 }
  0x24   :  { %s58_s11 = sshll.u32 %s266_s10, 4  ;;  %p225_p2 = scmp.ne.s32.totalorder %s354_s2, %s224_s14  ;;  %s59_s11 = int_to_ptr.vmem [resolvable:$true] %s58_s11 }
  0x25   :  { %p228_p3 = scmp.lt.u32.totalorder %s224_s14, %s354_s2 }
  0x27   :  { %p230_p4 = pnand %p228_p3, %p225_p2 }
  0x29   :  { %233 = shalt.err (!%p230_p4)
}
  0x2a   :  { %s234_s20 = scalar_lea.vmem %s59_s11, 256  ;;  %p239_p6 = scmp.lt.s32.totalorder %s59_s11, %s59_s11 }
  0x2b   :  { %p235_p5 = scmp.ne.s32.totalorder %s59_s11, %s234_s20  ;;  %p240_p7 = scmp.lt.s32.totalorder %s234_s20, %s234_s20 }
  0x2d   :  { %p241_p8 = por %p240_p7, %p239_p6 }
  0x2f   :  { %p242_p9 = pnand %p241_p8, %p235_p5 }
  0x31   :  { %245 = shalt.err (!%p242_p9)
}
  0x32   :  { %64 = dma.hbm_to_vmem [thread:$0]  %s354_s2, 256, %s59_s11, [#allocation7], %s264_s24, %s264_s24, %s265_s25  }
  0x33   :  { %256 = dma.done.wait [#allocation4], 256  }
  0x34   :  { %257 = vsyncadd [#allocation4], 4294967040 }
  0x35   :  { %258 = dma.done.wait [#allocation7], 512  }
  0x36   :  { %259 = vsyncadd [#allocation7], 4294966784  ;;  %v91_v0 = vld [vmem:[#allocation3] sm:$0xff]  ;;  %v92_v1 = vld [vmem:[#allocation3 + $0x8] sm:$0xff]  ;;  %s246_s23 = scalar_lea.hbm %s355_s3, 16 }
  0x37   :  { %v93_v2 = vld [vmem:[#allocation6] sm:$0xff]  ;;  %v94_v3 = vld [vmem:[#allocation6 + $0x8] sm:$0xff]  ;;  %v95_v5 = vld [vmem:[#allocation8] sm:$0xff]  ;;  %p247_p10 = scmp.ne.s32.totalorder %s355_s3, %s246_s23  ;;  %p250_p11 = scmp.lt.u32.totalorder %s246_s23, %s355_s3 }
  0x38   :  { %v97_v4 = vsub.f32 %v91_v0, %v93_v2  ;;  %v98_v6 = vsub.f32 %v92_v1, %v94_v3  ;;  %v96_v7 = vld [vmem:[#allocation8 + $0x8] sm:$0xff] }
  0x39   :  { %p252_p12 = pnand %p250_p11, %p247_p10 }
  0x3a   :  { %v99_v8 = vand.u32 2147483647, %v97_v4  ;;  %v100_v9 = vand.u32 2147483647, %v98_v6 }
  0x3c   :  { %v101_v10 = vmul.f32 %v99_v8, %v95_v5  ;;  %v102_v11 = vmul.f32 %v100_v9, %v96_v7 }
  0x3e   :  { %v111_v12 = vadd.f32 %v102_v11, %v101_v10 }
  0x40   :  { %140 = vadd.xlane.f32.xlu0 %v111_v12 }
  0xcd   :  { %v141_v13 = vpop.xlane.xlu0 %140 }
  0xce   :  { %v142_v14 = vrot.slane %v141_v13, 4 }
  0xd0   :  { %v143_v15 = vadd.f32 %v142_v14, %v141_v13 }
  0xd2   :  { %v144_v16 = vrot.slane %v143_v15, 2 }
  0xd4   :  { %v145_v17 = vadd.f32 %v144_v16, %v143_v15 }
  0xd6   :  { %v146_v18 = vrot.slane %v145_v17, 1 }
  0xd8   :  { %v147_v19 = vadd.f32 %v146_v18, %v145_v17 }
  0xda   :  { %172 = vpush %v147_v19 }
 0x10b   :  { %s173_s2 = spop %172 }
 0x10c   :  { %150 = sst [smem:[#allocation9]] %s173_s2 }
 0x10d   :  { %255 = shalt.err (!%p252_p12)
}
 0x10e   :  { %s267_s28 = smov [#allocation9]  }
 0x10f   :  { %158 = dma.smem_to_hbm %s267_s28, 16, %s355_s3, [#allocation5]  }
 0x110   :  { %260 = dma.done.wait [#allocation5], 16  }
 0x111   :  { %261 = vsyncadd [#allocation5], 4294967280 }
 0x112   :  { %162 = sfence }
 0x113   :  { %163 = vsyncpa [#allocation4], 1 }
 0x114   :  { %164 = vsyncpa [#allocation7], 1 }
 0x115   :  { %165 = vsyncpa [#allocation5], 1 }

</bundles_post_ra>
